<compile_context>
chip_gen: v5e
topology: v5e:2x2
jax: 0.10.0
libtpu: 0.0.40
codegen_flags: <defaults>
</compile_context>

<pallas_src>
import numpy as np
import jax
import jax.numpy as jnp
from jax.experimental import pallas as pl
from jax.experimental.pallas import tpu as pltpu


# ----------------------------------------------------------------------------
# Kernels
# ----------------------------------------------------------------------------
def _mlp(w_ref, fw_w_ref, fw_b_ref, fe_w_ref, fe_b_ref, hd_w_ref, hd_b_ref):
    """Shared fused MLP: W tile -> (mu, log_var) tile. Stays in vregs/VMEM."""
    h1 = jnp.maximum(
        jnp.dot(w_ref[...], fw_w_ref[...], preferred_element_type=jnp.float32)
        + fw_b_ref[...], 0.0)                                    # [T, 2h]
    h2 = jnp.maximum(
        jnp.dot(h1, fe_w_ref[...], preferred_element_type=jnp.float32)
        + fe_b_ref[...], 0.0)                                    # [T, h]
    heads = (jnp.dot(h2, hd_w_ref[...], preferred_element_type=jnp.float32)
             + hd_b_ref[...])                                    # [T, 2z]
    z_dim = heads.shape[-1] // 2
    mu = heads[:, :z_dim]
    lv = jnp.tanh(heads[:, z_dim:])
    return mu, lv


def _gauss_kernel(w_ref, z_ref,
                  fw_w_ref, fw_b_ref, fe_w_ref, fe_b_ref, hd_w_ref, hd_b_ref,
                  part_ref):
    """B is None branch: per-tile partial of the Gaussian log-likelihood."""
    mu, lv = _mlp(w_ref, fw_w_ref, fw_b_ref, fe_w_ref, fe_b_ref,
                  hd_w_ref, hd_b_ref)
    z = z_ref[...]
    # ((z - mu) * exp(-lv))**2 == (z - mu)**2 * exp(-2*lv)  (one fewer multiply)
    part = (-jnp.sum(lv)
            - 0.5 * jnp.sum((z - mu) ** 2 * jnp.exp(-2.0 * lv)))
    part_ref[pl.program_id(0)] = part


def _density_kernel(w_ref, z_ref, b_ref,
                    fw_w_ref, fw_b_ref, fe_w_ref, fe_b_ref, hd_w_ref, hd_b_ref,
                    d_ref, part_ref):
    """B branch (fully fused): MLP + density tensor D + per-tile sum(B * D)."""
    mu, lv = _mlp(w_ref, fw_w_ref, fw_b_ref, fe_w_ref, fe_b_ref,
                  hd_w_ref, hd_b_ref)
    z = z_ref[...]
    d = (-0.5 * (z[:, None, :] - mu[:, :, None]) ** 2
         * jnp.exp(-2.0 * lv[:, None, :])
         - lv[:, None, :])                                       # [T, z, z]
    # TODO(synk): for production z (multiples of 128) emit D as a lane-dense
    # [N, z*z] slab and reshape in the wrapper to avoid masked vst writeback.
    d_ref[...] = d
    part_ref[pl.program_id(0)] = jnp.sum(b_ref[...] * d)


# ----------------------------------------------------------------------------
# Parameter init (deterministic, PyTorch nn.Linear-like uniform init)
# ----------------------------------------------------------------------------
def init_params(key, w_dim, a_dim, z_dim, h_dim):
    def linear(k, fan_in, fan_out):
        k1, k2 = jax.random.split(k)
        bound = 1.0 / np.sqrt(fan_in)
        w = jax.random.uniform(k1, (fan_in, fan_out), jnp.float32, -bound, bound)
        b = jax.random.uniform(k2, (1, fan_out), jnp.float32, -bound, bound)
        return w, b

    ks = jax.random.split(key, 4)
    return {
        "fw": linear(ks[0], w_dim + a_dim, 2 * h_dim),
        "fe": linear(ks[1], 2 * h_dim, h_dim),
        "zm": linear(ks[2], h_dim, z_dim),
        "zv": linear(ks[3], h_dim, z_dim),
    }


# ----------------------------------------------------------------------------
# Forward wrapper (matches NewPersonalizer.forward semantics)
# ----------------------------------------------------------------------------
def _pick_tile(n, max_tile=256):
    """Largest batch tile <= max_tile that divides n (keeps blocks 8-aligned)."""
    if n <= max_tile:
        return n
    for t in range(max_tile, 0, -8):
        if n % t == 0:
            return t
    return n  # TODO(synk): pad + mask ragged batch sizes instead of untiled fallback.


def new_personalizer_forward(Z, W, A, params, B=None, tile_n=None):
    n, w_dim = W.shape
    z_dim = Z.shape[-1]

    fw_w, fw_b = params["fw"]
    fe_w, fe_b = params["fe"]
    zm_w, zm_b = params["zm"]
    zv_w, zv_b = params["zv"]

    # Fold A into the fw bias:  cat([W, A]) @ fw_w + fw_b
    #                        == W @ fw_w[:w] + (fw_b + A @ fw_w[w:])
    fw_w_eff = fw_w[:w_dim]                                      # [w, 2h]
    fw_b_eff = fw_b + A @ fw_w[w_dim:]                           # [1, 2h]
    # Fuse the zm / zv heads into one matmul.
    hd_w = jnp.concatenate([zm_w, zv_w], axis=-1)                # [h, 2z]
    hd_b = jnp.concatenate([zm_b, zv_b], axis=-1)                # [1, 2z]

    tn = tile_n if tile_n is not None else _pick_tile(n)
    assert n % tn == 0, "batch size must be divisible by the batch tile"
    num_tiles = n // tn

    def batch2d(feat):
        return pl.BlockSpec((tn, feat), lambda i: (i, 0))

    def resident(shape):
        return pl.BlockSpec(shape, lambda i: tuple(0 for _ in shape))

    weight_specs = [resident(fw_w_eff.shape), resident(fw_b_eff.shape),
                    resident(fe_w.shape), resident(fe_b.shape),
                    resident(hd_w.shape), resident(hd_b.shape)]
    smem_out = pl.BlockSpec(memory_space=pltpu.MemorySpace.SMEM)
    cparams = pltpu.CompilerParams(dimension_semantics=("arbitrary",))

    if B is None:
        parts = pl.pallas_call(
            _gauss_kernel,
            grid=(num_tiles,),
            in_specs=[batch2d(w_dim), batch2d(z_dim)] + weight_specs,
            out_specs=smem_out,
            out_shape=jax.ShapeDtypeStruct((num_tiles,), jnp.float32),
            compiler_params=cparams,
        )(W, Z, fw_w_eff, fw_b_eff, fe_w, fe_b, hd_w, hd_b)
        # Normalisation uses the FULL batch size, independent of tiling.
        const = jnp.float32(-0.5 * n * z_dim * np.log(2.0 * np.pi))
        res = (const + jnp.sum(parts)) / jnp.float32(n * z_dim)
        return res, None

    d, parts = pl.pallas_call(
        _density_kernel,
        grid=(num_tiles,),
        in_specs=[batch2d(w_dim), batch2d(z_dim),
                  pl.BlockSpec((tn, z_dim, z_dim), lambda i: (i, 0, 0))]
                 + weight_specs,
        out_specs=(pl.BlockSpec((tn, z_dim, z_dim), lambda i: (i, 0, 0)),
                   smem_out),
        out_shape=(jax.ShapeDtypeStruct((n, z_dim, z_dim), jnp.float32),
                   jax.ShapeDtypeStruct((num_tiles,), jnp.float32)),
        compiler_params=cparams,
    )(W, Z, B, fw_w_eff, fw_b_eff, fe_w, fe_b, hd_w, hd_b)
    s = jnp.sum(parts) / jnp.float32(n * z_dim)
    return s, d


# ----------------------------------------------------------------------------
# Pure-JAX reference for correctness check
# ----------------------------------------------------------------------------
def reference_forward(Z, W, A, params, B=None):
    n = W.shape[0]
    wa = jnp.concatenate([W, jnp.tile(A, (n, 1))], axis=-1)
    fw_w, fw_b = params["fw"]
    fe_w, fe_b = params["fe"]
    zm_w, zm_b = params["zm"]
    zv_w, zv_b = params["zv"]
    h1 = jax.nn.relu(wa @ fw_w + fw_b)
    h2 = jax.nn.relu(h1 @ fe_w + fe_b)
    mu = h2 @ zm_w + zm_b
    lv = jnp.tanh(h2 @ zv_w + zv_b)
    if B is None:
        res = (-0.5 * Z.shape[0] * Z.shape[1] * np.log(2 * np.pi)
               - jnp.sum(lv)
               - 0.5 * jnp.sum(((Z - mu) * jnp.exp(-1.0 * lv)) ** 2))
        return res / (Z.shape[0] * Z.shape[1]), None
    D = (-0.5 * (Z[:, None, :] - mu[:, :, None]) ** 2
         * jnp.exp(-2.0 * lv[:, None, :]) - lv[:, None, :])
    return jnp.sum(B * D) / (Z.shape[0] * Z.shape[-1]), D


# ----------------------------------------------------------------------------
if __name__ == "__main__":
    # Small shapes consistent with the module's forward signature.
    N, w_dim, a_dim, z_dim, h_dim = 16, 16, 8, 8, 32

    key = jax.random.PRNGKey(0)
    k_p, k_z, k_w, k_a, k_b = jax.random.split(key, 5)

    params = init_params(k_p, w_dim, a_dim, z_dim, h_dim)
    Z = jax.random.normal(k_z, (N, z_dim), jnp.float32)
    W = jax.random.normal(k_w, (N, w_dim), jnp.float32)
    A = jax.random.normal(k_a, (1, a_dim), jnp.float32)
    B = jax.random.normal(k_b, (N, z_dim, z_dim), jnp.float32)

    # Branch 1: B is None (tile_n=8 -> grid of 2, exercises the batch tiling).
    res1, _ = new_personalizer_forward(Z, W, A, params, B=None, tile_n=8)
    res1 = jax.block_until_ready(res1)
    ref1, _ = reference_forward(Z, W, A, params, B=None)
    np.testing.assert_allclose(np.asarray(res1), np.asarray(ref1),
                               rtol=1e-3, atol=1e-3)

    # Branch 2: B provided (single fused kernel: MLP + D + sum(B*D)).
    res2, D = new_personalizer_forward(Z, W, A, params, B=B, tile_n=8)
    res2 = jax.block_until_ready(res2)
    D = jax.block_until_ready(D)
    ref2, Dref = reference_forward(Z, W, A, params, B=B)
    np.testing.assert_allclose(np.asarray(res2), np.asarray(ref2),
                               rtol=1e-3, atol=1e-3)
    np.testing.assert_allclose(np.asarray(D), np.asarray(Dref),
                               rtol=1e-3, atol=1e-3)

    # Also run with the default (single-tile) tiling path.
    res3, _ = new_personalizer_forward(Z, W, A, params, B=None)
    res3 = jax.block_until_ready(res3)
    np.testing.assert_allclose(np.asarray(res3), np.asarray(ref1),
                               rtol=1e-3, atol=1e-3)

    print("KERNEL_OK")
</pallas_src>

<mosaic_0001>
module attributes {stable_mosaic.version = 11 : i64} {
  func.func @_gauss_kernel(%arg0: i32, %arg1: memref<8x16xf32, #tpu.memory_space<vmem>>, %arg2: memref<8x8xf32, #tpu.memory_space<vmem>>, %arg3: memref<16x64xf32, #tpu.memory_space<vmem>>, %arg4: memref<1x64xf32, #tpu.memory_space<vmem>>, %arg5: memref<64x32xf32, #tpu.memory_space<vmem>>, %arg6: memref<1x32xf32, #tpu.memory_space<vmem>>, %arg7: memref<32x16xf32, #tpu.memory_space<vmem>>, %arg8: memref<1x16xf32, #tpu.memory_space<vmem>>, %arg9: memref<2xf32, #tpu.memory_space<smem>>) attributes {dimension_semantics = [#tpu.dimension_semantics<arbitrary>], iteration_bounds = array<i64: 2>, scalar_prefetch = 0 : i64, scratch_operands = 0 : i64, tpu.core_type = #tpu.core_type<tc>, window_params = [{transform_indices = @transform_0, window_bounds = array<i64: 8, 16>}, {transform_indices = @transform_1, window_bounds = array<i64: 8, 8>}, {pipeline_mode = #tpu.pipeline_mode<synchronous>, transform_indices = @transform_2, window_bounds = array<i64: 16, 64>}, {pipeline_mode = #tpu.pipeline_mode<synchronous>, transform_indices = @transform_3, window_bounds = array<i64: 1, 64>}, {pipeline_mode = #tpu.pipeline_mode<synchronous>, transform_indices = @transform_4, window_bounds = array<i64: 64, 32>}, {pipeline_mode = #tpu.pipeline_mode<synchronous>, transform_indices = @transform_5, window_bounds = array<i64: 1, 32>}, {pipeline_mode = #tpu.pipeline_mode<synchronous>, transform_indices = @transform_6, window_bounds = array<i64: 32, 16>}, {pipeline_mode = #tpu.pipeline_mode<synchronous>, transform_indices = @transform_7, window_bounds = array<i64: 1, 16>}, {transform_indices = @transform_8, window_bounds = array<i64: 2>}]} {
    %c0 = arith.constant 0 : index
    %c0_0 = arith.constant 0 : index
    %0 = vector.load %arg1[%c0, %c0_0] : memref<8x16xf32, #tpu.memory_space<vmem>>, vector<8x16xf32>
    %c0_1 = arith.constant 0 : index
    %c0_2 = arith.constant 0 : index
    %1 = vector.load %arg3[%c0_1, %c0_2] : memref<16x64xf32, #tpu.memory_space<vmem>>, vector<16x64xf32>
    %cst = arith.constant dense<0.000000e+00> : vector<8x64xf32>
    %2 = tpu.matmul %0, %1, %cst {dimension_numbers = #tpu.dot_dimension_numbers<[1], [0], [0], [1], [0, 0, 1, 1], [], []>} : vector<8x16xf32>, vector<16x64xf32>, vector<8x64xf32> -> vector<8x64xf32>
    %c0_3 = arith.constant 0 : index
    %c0_4 = arith.constant 0 : index
    %3 = vector.load %arg4[%c0_3, %c0_4] : memref<1x64xf32, #tpu.memory_space<vmem>>, vector<1x64xf32>
    %4 = vector.broadcast %3 : vector<1x64xf32> to vector<8x64xf32>
    %5 = arith.addf %2, %4 : vector<8x64xf32>
    %cst_5 = arith.constant 0.000000e+00 : f32
    %6 = vector.broadcast %cst_5 : f32 to vector<8x64xf32>
    %7 = arith.maximumf %5, %6 : vector<8x64xf32>
    %c0_6 = arith.constant 0 : index
    %c0_7 = arith.constant 0 : index
    %8 = vector.load %arg5[%c0_6, %c0_7] : memref<64x32xf32, #tpu.memory_space<vmem>>, vector<64x32xf32>
    %cst_8 = arith.constant dense<0.000000e+00> : vector<8x32xf32>
    %9 = tpu.matmul %7, %8, %cst_8 {dimension_numbers = #tpu.dot_dimension_numbers<[1], [0], [0], [1], [0, 0, 1, 1], [], []>} : vector<8x64xf32>, vector<64x32xf32>, vector<8x32xf32> -> vector<8x32xf32>
    %c0_9 = arith.constant 0 : index
    %c0_10 = arith.constant 0 : index
    %10 = vector.load %arg6[%c0_9, %c0_10] : memref<1x32xf32, #tpu.memory_space<vmem>>, vector<1x32xf32>
    %11 = vector.broadcast %10 : vector<1x32xf32> to vector<8x32xf32>
    %12 = arith.addf %9, %11 : vector<8x32xf32>
    %cst_11 = arith.constant 0.000000e+00 : f32
    %13 = vector.broadcast %cst_11 : f32 to vector<8x32xf32>
    %14 = arith.maximumf %12, %13 : vector<8x32xf32>
    %c0_12 = arith.constant 0 : index
    %c0_13 = arith.constant 0 : index
    %15 = vector.load %arg7[%c0_12, %c0_13] : memref<32x16xf32, #tpu.memory_space<vmem>>, vector<32x16xf32>
    %cst_14 = arith.constant dense<0.000000e+00> : vector<8x16xf32>
    %16 = tpu.matmul %14, %15, %cst_14 {dimension_numbers = #tpu.dot_dimension_numbers<[1], [0], [0], [1], [0, 0, 1, 1], [], []>} : vector<8x32xf32>, vector<32x16xf32>, vector<8x16xf32> -> vector<8x16xf32>
    %c0_15 = arith.constant 0 : index
    %c0_16 = arith.constant 0 : index
    %17 = vector.load %arg8[%c0_15, %c0_16] : memref<1x16xf32, #tpu.memory_space<vmem>>, vector<1x16xf32>
    %18 = vector.broadcast %17 : vector<1x16xf32> to vector<8x16xf32>
    %19 = arith.addf %16, %18 : vector<8x16xf32>
    %20 = vector.extract_strided_slice %19 {offsets = [0, 0], sizes = [8, 8], strides = [1, 1]} : vector<8x16xf32> to vector<8x8xf32>
    %21 = vector.extract_strided_slice %19 {offsets = [0, 8], sizes = [8, 8], strides = [1, 1]} : vector<8x16xf32> to vector<8x8xf32>
    %22 = math.tanh %21 : vector<8x8xf32>
    %c0_17 = arith.constant 0 : index
    %c0_18 = arith.constant 0 : index
    %23 = vector.load %arg2[%c0_17, %c0_18] : memref<8x8xf32, #tpu.memory_space<vmem>>, vector<8x8xf32>
    %24 = vector.shape_cast %22 : vector<8x8xf32> to vector<1x8x8xf32>
    %cst_19 = arith.constant dense<0.000000e+00> : vector<1xf32>
    %25 = vector.multi_reduction <add>, %24, %cst_19 [1, 2] : vector<1x8x8xf32> to vector<1xf32>
    %26 = vector.shape_cast %25 : vector<1xf32> to vector<1x1x1xf32>
    %27 = vector.extract %26[0, 0, 0] : f32 from vector<1x1x1xf32>
    %cst_20 = arith.constant 0.000000e+00 : f32
    %28 = arith.subf %cst_20, %27 : f32
    %29 = arith.subf %23, %20 : vector<8x8xf32>
    %30 = arith.mulf %29, %29 : vector<8x8xf32>
    %cst_21 = arith.constant -2.000000e+00 : f32
    %31 = vector.broadcast %cst_21 : f32 to vector<8x8xf32>
    %32 = arith.mulf %31, %22 : vector<8x8xf32>
    %33 = math.exp %32 : vector<8x8xf32>
    %34 = arith.mulf %30, %33 : vector<8x8xf32>
    %35 = vector.shape_cast %34 : vector<8x8xf32> to vector<1x8x8xf32>
    %cst_22 = arith.constant dense<0.000000e+00> : vector<1xf32>
    %36 = vector.multi_reduction <add>, %35, %cst_22 [1, 2] : vector<1x8x8xf32> to vector<1xf32>
    %37 = vector.shape_cast %36 : vector<1xf32> to vector<1x1x1xf32>
    %38 = vector.extract %37[0, 0, 0] : f32 from vector<1x1x1xf32>
    %cst_23 = arith.constant 5.000000e-01 : f32
    %39 = arith.mulf %cst_23, %38 : f32
    %40 = arith.subf %28, %39 : f32
    %41 = arith.index_cast %arg0 : i32 to index
    %42 = memref.load %arg9[%41] : memref<2xf32, #tpu.memory_space<smem>>
    memref.store %40, %arg9[%41] : memref<2xf32, #tpu.memory_space<smem>>
    return
  }
  func.func @transform_0(%arg0: i32) -> (i32, i32) {
    %c0_i32 = arith.constant 0 : i32
    %c0_i32_0 = arith.constant 0 : i32
    return %arg0, %c0_i32 : i32, i32
  }
  func.func @transform_1(%arg0: i32) -> (i32, i32) {
    %c0_i32 = arith.constant 0 : i32
    %c0_i32_0 = arith.constant 0 : i32
    return %arg0, %c0_i32 : i32, i32
  }
  func.func @transform_2(%arg0: i32) -> (i32, i32) {
    %c0_i32 = arith.constant 0 : i32
    %c0_i32_0 = arith.constant 0 : i32
    %c0_i32_1 = arith.constant 0 : i32
    return %c0_i32, %c0_i32_0 : i32, i32
  }
  func.func @transform_3(%arg0: i32) -> (i32, i32) {
    %c0_i32 = arith.constant 0 : i32
    %c0_i32_0 = arith.constant 0 : i32
    %c0_i32_1 = arith.constant 0 : i32
    return %c0_i32, %c0_i32_0 : i32, i32
  }
  func.func @transform_4(%arg0: i32) -> (i32, i32) {
    %c0_i32 = arith.constant 0 : i32
    %c0_i32_0 = arith.constant 0 : i32
    %c0_i32_1 = arith.constant 0 : i32
    return %c0_i32, %c0_i32_0 : i32, i32
  }
  func.func @transform_5(%arg0: i32) -> (i32, i32) {
    %c0_i32 = arith.constant 0 : i32
    %c0_i32_0 = arith.constant 0 : i32
    %c0_i32_1 = arith.constant 0 : i32
    return %c0_i32, %c0_i32_0 : i32, i32
  }
  func.func @transform_6(%arg0: i32) -> (i32, i32) {
    %c0_i32 = arith.constant 0 : i32
    %c0_i32_0 = arith.constant 0 : i32
    %c0_i32_1 = arith.constant 0 : i32
    return %c0_i32, %c0_i32_0 : i32, i32
  }
  func.func @transform_7(%arg0: i32) -> (i32, i32) {
    %c0_i32 = arith.constant 0 : i32
    %c0_i32_0 = arith.constant 0 : i32
    %c0_i32_1 = arith.constant 0 : i32
    return %c0_i32, %c0_i32_0 : i32, i32
  }
  func.func @transform_8(%arg0: i32) -> i32 {
    %c0_i32 = arith.constant 0 : i32
    %c0_i32_0 = arith.constant 0 : i32
    return %c0_i32 : i32
  }
}

</mosaic_0001>

<bundles_post_ra>
// kernel: tpu_custom_call.1
= control target key start
LH: loop header
LB: loop body
LE: loop exit
PB: predicated region body
PF: predicated region fallthrough
CT: control target
= control target key end

     0   :  { %13 = vsyncpa [#allocation3], 0  ;;  %s625_s27 = smov 0   ;;  %s709_s0 = inlined_call_operand.vmem [shape: f32[16,16], index: 0, kind: input, shape index: {}]   ;;  %s710_s1 = inlined_call_operand.vmem [shape: f32[16,8], index: 1, kind: input, shape index: {}]   ;;  %s711_s2 = inlined_call_operand.vmem [shape: f32[16,64], index: 2, kind: input, shape index: {}]   ;;  %s712_s3 = inlined_call_operand.vmem [shape: f32[1,64], index: 3, kind: input, shape index: {}]   ;;  %s713_s4 = inlined_call_operand.vmem [shape: f32[64,32], index: 4, kind: input, shape index: {}]   ;;  %s714_s5 = inlined_call_operand.vmem [shape: f32[1,32], index: 5, kind: input, shape index: {}]   ;;  %s715_s6 = inlined_call_operand.vmem [shape: f32[32,16], index: 6, kind: input, shape index: {}]   ;;  %s716_s7 = inlined_call_operand.vmem [shape: f32[1,16], index: 7, kind: input, shape index: {}]   ;;  %s717_s8 = inlined_call_operand.hbm [shape: f32[2], index: 8, kind: output, shape index: {}]  }
   0x1 LB: > { %s631_s28 = sadd.s32 4294967295, %s576_s27   ;;  %p512_p0 = scmp.ge.s32.totalorder %s576_s27, 1  ;;  %s576_s27 = sphi %s625_s27, %s19_s27  }
   0x2   : > { %p266_p1 = scmp.lt.s32.totalorder %s576_s27, 3 }
   0x4   : > { %p267_p2 = pnand %p512_p0, %p266_p1 }
   0x5   : > { %p298_p3 = scmp.lt.s32.totalorder (!%p267_p2), %s631_s28, 1  ;;  %s578_s30 = smov (!%p267_p2), 120  }
   0x6   : > { %270 = sbr.rel (%p267_p2) target bundleno = 747 (0x2eb), region = 52  ;;  %s455_s17 = sshll.u32 (!%p267_p2), %s717_s8, 4  ;;  %s456_s17 = int_to_ptr.hbm [resolvable:$true] %s455_s17 }
   0x7   : > { %p533_p4 = scmp.eq.s32.totalorder (!%p267_p2), %s631_s28, 1  ;;  %s579_s22 = smov (!%p267_p2), [#allocation2]  }
   0xb   : > { %v308_v0 = vld [vmem:[%s711_s2 + $0x8] sm:$0xff]  ;;  %v307_v1 = vld [vmem:[%s711_s2] sm:$0xff]  ;;  %v345_v2 = vld [vmem:[%s713_s4 + $0x38] sm:$0xff]  ;;  %s649_s15 = scalar_select %p298_p3, %s631_s28, 1  ;;  %vm313_vm0 = vcmask 130048   ;;  %vm350_vm1 = vcmask 523264  }
   0xc   : > { %331 = vmatpush.msra.mxu0 %v308_v0  ;;  %362 = vmatpush.msra.mxu1 %v345_v2  ;;  %v344_v3 = vld [vmem:[%s713_s4 + $0x30] sm:$0xff]  ;;  %v343_v4 = vld [vmem:[%s713_s4 + $0x28] sm:$0xff]  ;;  %v342_v5 = vld [vmem:[%s713_s4 + $0x20] sm:$0xff]  ;;  %vm383_vm2 = vcmask 261120   ;;  %vm413_vm3 = vcmask 64512  }
   0xd   : > { %s513_s18 = sshll.u32 %s649_s15, 3  ;;  %v341_v7 = vld [vmem:[%s713_s4 + $0x18] sm:$0xff]  ;;  %v340_v8 = vld [vmem:[%s713_s4 + $0x10] sm:$0xff]  ;;  %v339_v9 = vld [vmem:[%s713_s4 + $0x8] sm:$0xff] }
   0xe   : > { %332 = vmatpush.msra.mxu0 %v307_v1  ;;  %363 = vmatpush.msra.mxu1 %v344_v3  ;;  %s301_s23 = scalar_lea.vmem %s709_s0, %s513_s18  ;;  %v338_v10 = vld [vmem:[%s713_s4] sm:$0xff]  ;;  %v378_v11 = vld [vmem:[%s715_s6 + $0x18] sm:$0xff]  ;;  %v377_v16 = vld [vmem:[%s715_s6 + $0x10] sm:$0xff]  ;;  %s305_s11 = scalar_lea.vmem %s710_s1, %s513_s18 }
   0xf   : > { %v306_v6 = vld [vmem:[%s301_s23] sm:$0xff]  ;;  %399 = vmatpush.msra.mxu2 %v378_v11  ;;  %v376_v17 = vld [vmem:[%s715_s6 + $0x8] sm:$0xff]  ;;  %s523_s18 = scalar_lea.smem [#allocation2], %s576_s27 }
  0x10   : > { %364 = vmatpush.msra.mxu1 %v343_v4  ;;  %515 = vmatmul.msk.f32.vlgmr.msra.gmra.mxu0 %vm313_vm0, %v306_v6  ;;  %v545_v12 = vld [vmem:[%s712_s3] ss:$0 sm:$0xff]  ;;  %s524_s12 = scalar_lea.smem %s523_s18, 4294967295 [#allocation2] }
  0x11   : > { %400 = vmatpush.msra.mxu2 %v377_v16  ;;  %v375_v18 = vld [vmem:[%s715_s6] sm:$0xff] }
  0x12   : > { %365 = vmatpush.msra.mxu1 %v342_v5  ;;  %v546_v19 = vld [vmem:[%s714_s5] ss:$0 sm:$0xff] }
  0x13   : > { %401 = vmatpush.msra.mxu2 %v376_v17  ;;  %v547_v23 = vld [vmem:[%s716_s7] ss:$0 sm:$0xff] }
  0x14   : > { %366 = vmatpush.msra.mxu1 %v341_v7  ;;  %v408_v31 = vld [vmem:[%s305_s11] sm:$0xff] }
  0x15   : > { %402 = vmatpush.msra.mxu2 %v375_v18 }
  0x16   : > { %367 = vmatpush.msra.mxu1 %v340_v8 }
  0x18   : > { %368 = vmatpush.msra.mxu1 %v339_v9 }
  0x1a   : > { %369 = vmatpush.msra.mxu1 %v338_v10 }
  0x8d   : > { %v334_v13 = vpop.f32.mrf.mxu0 }
  0x8e   : > { %v335_v14 = vadd.f32 %v545_v12, %v334_v13 }
  0x90   : > { %v337_v15 = vmax.f32 %v335_v14, 0.0 }
  0x92   : > { %516 = vmatmul.msk.f32.vlgmr.msra.gmra.mxu1 %vm350_vm1, %v337_v15 }
 0x10f   : > { %v371_v20 = vpop.f32.mrf.mxu1 }
 0x110   : > { %v372_v21 = vadd.f32 %v546_v19, %v371_v20 }
 0x112   : > { %v374_v22 = vmax.f32 %v372_v21, 0.0 }
 0x114   : > { %517 = vmatmul.msk.f32.vlgmr.msra.gmra.mxu2 %vm383_vm2, %v374_v22 }
 0x197   : > { %v404_v24 = vpop.f32.mrf.mxu2 }
 0x198   : > { %v405_v25 = vadd.f32 %v547_v23, %v404_v24 }
 0x19a   : > { %548 = vtanh.f32 %v405_v25  ;;  %v425_v32 = vsub.f32 %v408_v31, %v405_v25 }
 0x19c   : > { %v426_v35 = vmul.f32 %v425_v32, %v425_v32 }
 0x1a0   : > { %v549_v26 = vpop.eup %548 }
 0x1a1   : > { %v427_v27 = vmul.f32 -2.0, %v549_v26 }
 0x1a3   : > { %v428_v28 = vmul.f32 1.442695, %v427_v27 }
 0x1a5   : > { %550 = vpow2.f32 %v428_v28 }
 0x1ab   : > { %v551_v29 = vpop.eup %550 }
 0x1ac   : > { %431 = vrot.lane.b32.xlu0 %v551_v29, %s578_s30 }
 0x1b4   : > { %410 = vrot.lane.b32.xlu0 %v549_v26, %s578_s30 }
 0x21e   : > { %v432_v30 = vpop.permute.xlu0 %431 }
 0x21f   : > { %v434_v36 = vmul.f32 %v432_v30, %v426_v35 }
 0x221   : > { %v435_v37 = vsel %vm413_vm3, %v434_v36, 0.0 }
 0x226   : > { %v411_v33 = vpop.permute.xlu0 %410 }
 0x227   : > { %v414_v34 = vsel %vm413_vm3, %v411_v33, 0.0 }
 0x228   : > { %415 = vadd.xlane.f32.xlu1 %v414_v34 }
 0x230   : > { %436 = vadd.xlane.f32.xlu1 %v435_v37 }
 0x29b   : > { %v416_v38 = vpop.xlane.xlu1 %415 }
 0x29c   : > { %v417_v39 = vrot.slane %v416_v38, 4 }
 0x29e   : > { %v418_v40 = vadd.f32 %v417_v39, %v416_v38 }
 0x2a0   : > { %v419_v41 = vrot.slane %v418_v40, 2 }
 0x2a2   : > { %v420_v42 = vadd.f32 %v419_v41, %v418_v40 }
 0x2a3   : > { %v437_v43 = vpop.xlane.xlu1 %436 }
 0x2a4   : > { %v438_v44 = vrot.slane %v437_v43, 4  ;;  %v421_v45 = vrot.slane %v420_v42, 1 }
 0x2a6   : > { %v439_v46 = vadd.f32 %v438_v44, %v437_v43  ;;  %v422_v47 = vadd.f32 %v421_v45, %v420_v42 }
 0x2a8   : > { %v440_v48 = vrot.slane %v439_v46, 2  ;;  %525 = vpush %v422_v47 }
 0x2aa   : > { %v441_v49 = vadd.f32 %v440_v48, %v439_v46 }
 0x2ac   : > { %v442_v50 = vrot.slane %v441_v49, 1 }
 0x2ae   : > { %v443_v51 = vadd.f32 %v442_v50, %v441_v49 }
 0x2b0   : > { %527 = vpush %v443_v51 }
 0x2d9   : > { %s526_s15 = spop %525 }
 0x2da   : > { %s424_s19 = ssub.f32 0.0, %s526_s15 }
 0x2e1   : > { %s528_s13 = spop %527 }
 0x2e2   : > { %s445_s20 = smul.f32 0.5, %s528_s13 }
 0x2e4   : > { %s446_s21 = ssub.f32 %s424_s19, %s445_s20 }
 0x2e6   : > { %448 = sst [smem:[%s524_s12]] %s446_s21 }
 0x2e7   : > { %530 = dma.smem_to_hbm (%p533_p4), %s579_s22, 16, %s456_s17, [#allocation3]  }
 0x2e8   : > { %571 = dma.done.wait (%p533_p4), [#allocation3], 16  }
 0x2e9   : > { %573 = vsyncadd (%p533_p4), [#allocation3], 4294967280 }
 0x2ea   : > { %464 = sfence }
 0x2eb PF: > { %s19_s27 = sadd.s32 1, %s576_s27  }
 0x2ec   : > { %p16_p5 = scmp.ge.s32.totalorder %s19_s27, 4  }
 0x2ee   :  { %18 = sbr.rel (!%p16_p5) target bundleno = 1 (0x1), region = 83 }
 0x2f3   :  { %470 = vsyncpa [#allocation3], 1 }
 0x2f4   :  { %472 = vsyncpa [#allocation3 + $0x1], 1 }

</bundles_post_ra>
